<compile_context>
chip_gen: v7x
topology: tpu7x:2x2x1
jax: 0.10.0
libtpu: 0.0.40
codegen_flags: <defaults>
</compile_context>

<pallas_src>
import jax
import jax.numpy as jnp
from jax.experimental import pallas as pl
from jax.experimental.pallas import tpu as pltpu

HIDDEN = 50     # logical hidden size of the torch module
LANE = 128      # TPU lane width; L is padded to a multiple of this
H_ALIGN = 64    # hidden padded to a multiple of this


def _round_up(n, m):
    return ((n + m - 1) // m) * m


def _reverse_model_kernel(t_ref, x_ref, w1_ref, b12_ref, w2_ref, wo_ref, bo_ref, o_ref):
    # t_ref (SMEM scalar) is only consumed by the BlockSpec index_maps.
    del t_ref
    x = x_ref[...]                                                   # [TB, Lp]
    # shared layer 1: Linear(L, H) + ReLU
    h1 = jnp.dot(x, w1_ref[...], preferred_element_type=jnp.float32) + b12_ref[0:1, :]
    h1 = jnp.maximum(h1, 0.0)
    # shared layer 2: Linear(H, H) + ReLU
    h2 = jnp.dot(h1, w2_ref[...], preferred_element_type=jnp.float32) + b12_ref[1:2, :]
    h2 = jnp.maximum(h2, 0.0)
    # selected output head (chosen by scalar-prefetched t in the index_map): Linear(H, L) + Sigmoid
    logits = jnp.dot(h2, wo_ref[...], preferred_element_type=jnp.float32) + bo_ref[...]
    o_ref[...] = jax.nn.sigmoid(logits)


def reverse_model_forward(x, padded, t):
    """x: [B, L] float32 (logical shapes). padded: dict from pad_params.
    t: 1-based head index (Python int or int32 scalar/array) -- runtime value."""
    B, L = x.shape
    Lp, Hp = padded["w1"].shape
    T = padded["wo_all"].shape[0]

    # Batch tile: multiple of 8 sublanes, capped so x/out tiles stay tiny in VMEM
    # (budget vs 64 MiB on v7x; at 512x128 f32 a double-buffered tile is 512 KiB).
    TB = min(_round_up(max(B, 1), 8), 512)
    Bp = _round_up(B, TB)

    xp = jnp.zeros((Bp, Lp), jnp.float32).at[:B, :L].set(x.astype(jnp.float32))
    t_arr = jnp.asarray(t, jnp.int32).reshape((1,))

    out = pl.pallas_call(
        _reverse_model_kernel,
        out_shape=jax.ShapeDtypeStruct((Bp, Lp), jnp.float32),
        grid_spec=pltpu.PrefetchScalarGridSpec(
            num_scalar_prefetch=1,
            grid=(Bp // TB,),
            in_specs=[
                pl.BlockSpec((TB, Lp), lambda i, t_ref: (i, 0)),                 # x tile
                pl.BlockSpec((Lp, Hp), lambda i, t_ref: (0, 0)),                 # w1 (resident)
                pl.BlockSpec((2, Hp), lambda i, t_ref: (0, 0)),                  # [b1; b2]
                pl.BlockSpec((Hp, Hp), lambda i, t_ref: (0, 0)),                 # w2 (resident)
                pl.BlockSpec((None, Hp, Lp), lambda i, t_ref: (t_ref[0] - 1, 0, 0)),  # head W
                pl.BlockSpec((None, 1, Lp), lambda i, t_ref: (t_ref[0] - 1, 0, 0)),   # head b
            ],
            out_specs=pl.BlockSpec((TB, Lp), lambda i, t_ref: (i, 0)),
        ),
        compiler_params=pltpu.CompilerParams(
            dimension_semantics=("parallel",),     # batch axis: shards across v7x's 2 TCs
        ),
    )(t_arr, xp, padded["w1"], padded["b12"], padded["w2"],
      padded["wo_all"], padded["bo_all"])

    return out[:B, :L]


def init_params(key, sequence_length, T, hidden=HIDDEN):
    """Logical (unpadded) parameters, PyTorch-Linear-like but stored [in, out]."""
    k = jax.random.split(key, 6)
    s1 = 1.0 / jnp.sqrt(sequence_length)
    sh = 1.0 / jnp.sqrt(hidden)
    return {
        "w1": jax.random.uniform(k[0], (sequence_length, hidden), jnp.float32, -s1, s1),
        "b1": jax.random.uniform(k[1], (hidden,), jnp.float32, -s1, s1),
        "w2": jax.random.uniform(k[2], (hidden, hidden), jnp.float32, -sh, sh),
        "b2": jax.random.uniform(k[3], (hidden,), jnp.float32, -sh, sh),
        "wo_all": jax.random.uniform(k[4], (T, hidden, sequence_length), jnp.float32, -sh, sh),
        "bo_all": jax.random.uniform(k[5], (T, sequence_length), jnp.float32, -sh, sh),
    }


def pad_params(params):
    """One-time zero-padding: L -> multiple of 128 (lane-dense), H -> multiple of 64.
    Zero pads + ReLU(0)=0 keep the forward math identical on the logical slice."""
    L, H = params["w1"].shape
    T = params["wo_all"].shape[0]
    Lp = _round_up(L, LANE)
    Hp = _round_up(H, H_ALIGN)
    w1 = jnp.zeros((Lp, Hp), jnp.float32).at[:L, :H].set(params["w1"])
    w2 = jnp.zeros((Hp, Hp), jnp.float32).at[:H, :H].set(params["w2"])
    b12 = (jnp.zeros((2, Hp), jnp.float32)
           .at[0, :H].set(params["b1"])
           .at[1, :H].set(params["b2"]))
    wo = jnp.zeros((T, Hp, Lp), jnp.float32).at[:, :H, :L].set(params["wo_all"])
    bo = jnp.zeros((T, 1, Lp), jnp.float32).at[:, 0, :L].set(params["bo_all"])
    return {"w1": w1, "w2": w2, "b12": b12, "wo_all": wo, "bo_all": bo}


def reference_forward(x, params, t):
    """Pure-JAX reference mirroring the PyTorch module (unpadded)."""
    h = jnp.maximum(x @ params["w1"] + params["b1"], 0.0)
    h = jnp.maximum(h @ params["w2"] + params["b2"], 0.0)
    logits = h @ params["wo_all"][t - 1] + params["bo_all"][t - 1]
    return jax.nn.sigmoid(logits)


if __name__ == "__main__":
    sequence_length = 16
    T = 3
    batch = 8

    key = jax.random.PRNGKey(0)
    kx, kp = jax.random.split(key)
    x = jax.random.normal(kx, (batch, sequence_length), dtype=jnp.float32)
    params = init_params(kp, sequence_length, T)
    padded = pad_params(params)

    # All heads share one compiled kernel: t is a runtime SMEM scalar, no retrace per t.
    for t in (1, 2, 3):
        out = jax.block_until_ready(reverse_model_forward(x, padded, t))
        ref = reference_forward(x, params, t)
        assert out.shape == (batch, sequence_length)
        assert jnp.allclose(out, ref, atol=1e-5, rtol=1e-5), f"mismatch vs reference at t={t}"

    print("KERNEL_OK")
</pallas_src>

<mosaic_0001>
module attributes {stable_mosaic.version = 11 : i64} {
  func.func @_reverse_model_kernel(%arg0: i32, %arg1: memref<1xi32, #tpu.memory_space<smem>>, %arg2: memref<8x128xf32, #tpu.memory_space<vmem>>, %arg3: memref<128x64xf32, #tpu.memory_space<vmem>>, %arg4: memref<2x64xf32, #tpu.memory_space<vmem>>, %arg5: memref<64x64xf32, #tpu.memory_space<vmem>>, %arg6: memref<1x64x128xf32, #tpu.memory_space<vmem>>, %arg7: memref<1x1x128xf32, #tpu.memory_space<vmem>>, %arg8: memref<8x128xf32, #tpu.memory_space<vmem>>) attributes {dimension_semantics = [#tpu.dimension_semantics<parallel>], iteration_bounds = array<i64: 1>, scalar_prefetch = 1 : i64, scratch_operands = 0 : i64, tpu.core_type = #tpu.core_type<tc>, window_params = [{transform_indices = @transform_0, window_bounds = array<i64: 8, 128>}, {pipeline_mode = #tpu.pipeline_mode<synchronous>, transform_indices = @transform_1, window_bounds = array<i64: 128, 64>}, {pipeline_mode = #tpu.pipeline_mode<synchronous>, transform_indices = @transform_2, window_bounds = array<i64: 2, 64>}, {pipeline_mode = #tpu.pipeline_mode<synchronous>, transform_indices = @transform_3, window_bounds = array<i64: 64, 64>}, {transform_indices = @transform_4, window_bounds = array<i64: 1, 64, 128>}, {transform_indices = @transform_5, window_bounds = array<i64: 1, 1, 128>}, {transform_indices = @transform_6, window_bounds = array<i64: 8, 128>}]} {
    %c0 = arith.constant 0 : index
    %c0_0 = arith.constant 0 : index
    %0 = vector.load %arg2[%c0, %c0_0] : memref<8x128xf32, #tpu.memory_space<vmem>>, vector<8x128xf32>
    %c0_1 = arith.constant 0 : index
    %c0_2 = arith.constant 0 : index
    %1 = vector.load %arg3[%c0_1, %c0_2] : memref<128x64xf32, #tpu.memory_space<vmem>>, vector<128x64xf32>
    %cst = arith.constant dense<0.000000e+00> : vector<8x64xf32>
    %2 = tpu.matmul %0, %1, %cst {dimension_numbers = #tpu.dot_dimension_numbers<[1], [0], [0], [1], [0, 0, 1, 1], [], []>} : vector<8x128xf32>, vector<128x64xf32>, vector<8x64xf32> -> vector<8x64xf32>
    %c0_3 = arith.constant 0 : index
    %c0_4 = arith.constant 0 : index
    %3 = vector.load %arg4[%c0_3, %c0_4] : memref<2x64xf32, #tpu.memory_space<vmem>>, vector<1x64xf32>
    %4 = vector.broadcast %3 : vector<1x64xf32> to vector<8x64xf32>
    %5 = arith.addf %2, %4 : vector<8x64xf32>
    %cst_5 = arith.constant 0.000000e+00 : f32
    %6 = vector.broadcast %cst_5 : f32 to vector<8x64xf32>
    %7 = arith.maximumf %5, %6 : vector<8x64xf32>
    %c0_6 = arith.constant 0 : index
    %c0_7 = arith.constant 0 : index
    %8 = vector.load %arg5[%c0_6, %c0_7] : memref<64x64xf32, #tpu.memory_space<vmem>>, vector<64x64xf32>
    %cst_8 = arith.constant dense<0.000000e+00> : vector<8x64xf32>
    %9 = tpu.matmul %7, %8, %cst_8 {dimension_numbers = #tpu.dot_dimension_numbers<[1], [0], [0], [1], [0, 0, 1, 1], [], []>} : vector<8x64xf32>, vector<64x64xf32>, vector<8x64xf32> -> vector<8x64xf32>
    %c1 = arith.constant 1 : index
    %c0_9 = arith.constant 0 : index
    %10 = vector.load %arg4[%c1, %c0_9] : memref<2x64xf32, #tpu.memory_space<vmem>>, vector<1x64xf32>
    %11 = vector.broadcast %10 : vector<1x64xf32> to vector<8x64xf32>
    %12 = arith.addf %9, %11 : vector<8x64xf32>
    %cst_10 = arith.constant 0.000000e+00 : f32
    %13 = vector.broadcast %cst_10 : f32 to vector<8x64xf32>
    %14 = arith.maximumf %12, %13 : vector<8x64xf32>
    %c0_11 = arith.constant 0 : index
    %c0_12 = arith.constant 0 : index
    %c0_13 = arith.constant 0 : index
    %15 = vector.load %arg6[%c0_11, %c0_12, %c0_13] : memref<1x64x128xf32, #tpu.memory_space<vmem>>, vector<1x64x128xf32>
    %16 = vector.shape_cast %15 : vector<1x64x128xf32> to vector<64x128xf32>
    %cst_14 = arith.constant dense<0.000000e+00> : vector<8x128xf32>
    %17 = tpu.matmul %14, %16, %cst_14 {dimension_numbers = #tpu.dot_dimension_numbers<[1], [0], [0], [1], [0, 0, 1, 1], [], []>} : vector<8x64xf32>, vector<64x128xf32>, vector<8x128xf32> -> vector<8x128xf32>
    %c0_15 = arith.constant 0 : index
    %c0_16 = arith.constant 0 : index
    %c0_17 = arith.constant 0 : index
    %18 = vector.load %arg7[%c0_15, %c0_16, %c0_17] : memref<1x1x128xf32, #tpu.memory_space<vmem>>, vector<1x1x128xf32>
    %19 = vector.shape_cast %18 : vector<1x1x128xf32> to vector<1x128xf32>
    %20 = vector.broadcast %19 : vector<1x128xf32> to vector<8x128xf32>
    %21 = arith.addf %17, %20 : vector<8x128xf32>
    %22 = arith.negf %21 : vector<8x128xf32>
    %23 = math.exp %22 : vector<8x128xf32>
    %cst_18 = arith.constant 1.000000e+00 : f32
    %24 = vector.broadcast %cst_18 : f32 to vector<8x128xf32>
    %25 = arith.addf %24, %23 : vector<8x128xf32>
    %26 = arith.divf %24, %25 : vector<8x128xf32>
    %c0_19 = arith.constant 0 : index
    %c0_20 = arith.constant 0 : index
    %27 = vector.load %arg8[%c0_19, %c0_20] : memref<8x128xf32, #tpu.memory_space<vmem>>, vector<8x128xf32>
    tpu.vector_store %arg8[%c0_19, %c0_20], %26 {strides = array<i32>} : memref<8x128xf32, #tpu.memory_space<vmem>>, vector<8x128xf32>,
    return
  }
  func.func @transform_0(%arg0: i32, %arg1: memref<1xi32, #tpu.memory_space<smem>>) -> (i32, i32) {
    %c0_i32 = arith.constant 0 : i32
    %c0_i32_0 = arith.constant 0 : i32
    return %arg0, %c0_i32 : i32, i32
  }
  func.func @transform_1(%arg0: i32, %arg1: memref<1xi32, #tpu.memory_space<smem>>) -> (i32, i32) {
    %c0_i32 = arith.constant 0 : i32
    %c0_i32_0 = arith.constant 0 : i32
    %c0_i32_1 = arith.constant 0 : i32
    return %c0_i32, %c0_i32_0 : i32, i32
  }
  func.func @transform_2(%arg0: i32, %arg1: memref<1xi32, #tpu.memory_space<smem>>) -> (i32, i32) {
    %c0_i32 = arith.constant 0 : i32
    %c0_i32_0 = arith.constant 0 : i32
    %c0_i32_1 = arith.constant 0 : i32
    return %c0_i32, %c0_i32_0 : i32, i32
  }
  func.func @transform_3(%arg0: i32, %arg1: memref<1xi32, #tpu.memory_space<smem>>) -> (i32, i32) {
    %c0_i32 = arith.constant 0 : i32
    %c0_i32_0 = arith.constant 0 : i32
    %c0_i32_1 = arith.constant 0 : i32
    return %c0_i32, %c0_i32_0 : i32, i32
  }
  func.func @transform_4(%arg0: i32, %arg1: memref<1xi32, #tpu.memory_space<smem>>) -> (i32, i32, i32) {
    %c0 = arith.constant 0 : index
    %0 = memref.load %arg1[%c0] : memref<1xi32, #tpu.memory_space<smem>>
    %c1_i32 = arith.constant 1 : i32
    %1 = arith.subi %0, %c1_i32 : i32
    %c0_i32 = arith.constant 0 : i32
    %c0_i32_0 = arith.constant 0 : i32
    %c0_i32_1 = arith.constant 0 : i32
    return %1, %c0_i32, %c0_i32_0 : i32, i32, i32
  }
  func.func @transform_5(%arg0: i32, %arg1: memref<1xi32, #tpu.memory_space<smem>>) -> (i32, i32, i32) {
    %c0 = arith.constant 0 : index
    %0 = memref.load %arg1[%c0] : memref<1xi32, #tpu.memory_space<smem>>
    %c1_i32 = arith.constant 1 : i32
    %1 = arith.subi %0, %c1_i32 : i32
    %c0_i32 = arith.constant 0 : i32
    %c0_i32_0 = arith.constant 0 : i32
    %c0_i32_1 = arith.constant 0 : i32
    return %1, %c0_i32, %c0_i32_0 : i32, i32, i32
  }
  func.func @transform_6(%arg0: i32, %arg1: memref<1xi32, #tpu.memory_space<smem>>) -> (i32, i32) {
    %c0_i32 = arith.constant 0 : i32
    %c0_i32_0 = arith.constant 0 : i32
    return %arg0, %c0_i32 : i32, i32
  }
}

</mosaic_0001>

<bundles_post_ra>
// kernel: tpu_custom_call.1
= control target key start
LH: loop header
LB: loop body
LE: loop exit
PB: predicated region body
PF: predicated region fallthrough
CT: control target
= control target key end

     0   :  { %13 = vsyncpa [#allocation5], 0  ;;  %s775_s0 = inlined_call_operand.<no memory space> [shape: s32[1], index: 0, kind: input, shape index: {}]   ;;  %s776_s1 = inlined_call_operand.vmem [shape: f32[8,128], index: 1, kind: input, shape index: {}]   ;;  %s777_s2 = inlined_call_operand.vmem [shape: f32[128,64], index: 2, kind: input, shape index: {}]   ;;  %s778_s3 = inlined_call_operand.vmem [shape: f32[2,64], index: 3, kind: input, shape index: {}]   ;;  %s779_s4 = inlined_call_operand.hbm [shape: f32[64,64], index: 4, kind: input, shape index: {}]   ;;  %s780_s5 = inlined_call_operand.vmem [shape: f32[3,64,128], index: 5, kind: input, shape index: {}]   ;;  %s781_s6 = inlined_call_operand.vmem [shape: f32[3,1,128], index: 6, kind: input, shape index: {}]   ;;  %s782_s7 = inlined_call_operand.hbm [shape: f32[8,128], index: 7, kind: output, shape index: {}]  }
   0x1   :  { %14 = vsyncpa [#allocation6], 0  ;;  %s610_s24 = smov [#allocation4]   ;;  %s562_s28 = scalar_lea.hbm %s779_s4, 1024 }
   0x2   :  { %s26_s25 = sshll.u32 %s610_s24, 4  ;;  %p563_p0 = scmp.ne.s32.totalorder %s779_s4, %s562_s28  ;;  %s27_s25 = int_to_ptr.vmem [resolvable:$true] %s26_s25 }
   0x3   :  { %p566_p1 = scmp.lt.u32.totalorder %s562_s28, %s779_s4 }
   0x5   :  { %p568_p2 = pnand %p566_p1, %p563_p0 }
   0x7   :  { %571 = shalt.err (!%p568_p2)
}
   0x8   :  { %s572_s10 = scalar_lea.vmem %s27_s25, 1024  ;;  %p577_p4 = scmp.lt.s32.totalorder %s27_s25, %s27_s25 }
   0x9   :  { %p573_p3 = scmp.ne.s32.totalorder %s27_s25, %s572_s10  ;;  %p578_p5 = scmp.lt.s32.totalorder %s572_s10, %s572_s10 }
   0xb   :  { %p579_p6 = por %p578_p5, %p577_p4 }
   0xd   :  { %p580_p7 = pnand %p579_p6, %p573_p3 }
   0xf   :  { %583 = shalt.err (!%p580_p7)
}
  0x10   :  { %s611_s11 = smov 128   ;;  %s612_s12 = smov 8  }
  0x11   :  { %32 = dma.hbm_to_vmem [thread:$0]  %s779_s4, 1024, %s27_s25, [#allocation5], %s611_s11, %s611_s11, %s612_s12  }
  0x12   :  { %606 = dma.done.wait [#allocation5], 1024  }
  0x13   :  { %607 = vsyncadd [#allocation5], 4294966272  ;;  %v613_v0 = vmov 0.0|0.0   ;;  %vm614_vm0 = vmmov 0   ;;  %v615_v1 = vmov 0.0   ;;  %v85_v2 = vld [vmem:[%s777_s2] sm:$0xff] }
  0x14   :  { %503 = vmatprep.subr.bf16.mxu0 %v613_v0  ;;  %462 = vmatprep.mubr.msk.f32.mxu0 %vm614_vm0, %v615_v1  ;;  %v86_v3 = vld [vmem:[%s777_s2 + $0x8] sm:$0xff]  ;;  %v87_v4 = vld [vmem:[%s777_s2 + $0x10] sm:$0xff]  ;;  %v88_v6 = vld [vmem:[%s777_s2 + $0x18] sm:$0xff]  ;;  %vm190_vm1 = vcmask 523264  }
  0x15   :  { %527 = vmatprep.subr.bf16.mxu1 %v613_v0  ;;  %481 = vmatprep.mubr.msk.f32.mxu1 %vm614_vm0, %v615_v1  ;;  %v504_v5 = vpack.c.bf16 %v86_v3, %v85_v2  ;;  %v507_v7 = vpack.c.bf16 %v88_v6, %v87_v4  ;;  %v89_v8 = vld [vmem:[%s777_s2 + $0x20] sm:$0xff]  ;;  %v90_v9 = vld [vmem:[%s777_s2 + $0x28] sm:$0xff]  ;;  %v179_v12 = vld [vmem:[#allocation4 + $0x10] sm:$0xff] }
  0x16   :  { %v177_v10 = vld [vmem:[#allocation4] sm:$0xff]  ;;  %v178_v11 = vld [vmem:[#allocation4 + $0x8] sm:$0xff]  ;;  %v180_v13 = vld [vmem:[#allocation4 + $0x18] sm:$0xff]  ;;  %v510_v14 = vpack.c.bf16 %v90_v9, %v89_v8 }
  0x17   :  { %505 = vmatpush3.bf16.msra.mxu0 %v504_v5  ;;  %v528_v15 = vpack.c.bf16 %v178_v11, %v177_v10  ;;  %v91_v16 = vld [vmem:[%s777_s2 + $0x30] sm:$0xff]  ;;  %v92_v17 = vld [vmem:[%s777_s2 + $0x38] sm:$0xff]  ;;  %v531_v18 = vpack.c.bf16 %v180_v13, %v179_v12  ;;  %v181_v19 = vld [vmem:[#allocation4 + $0x20] sm:$0xff] }
  0x18   :  { %506 = vmatprep.subr.bf16.mxu0 %v613_v0  ;;  %v182_v20 = vld [vmem:[#allocation4 + $0x28] sm:$0xff]  ;;  %v513_v21 = vpack.c.bf16 %v92_v17, %v91_v16  ;;  %v93_v22 = vld [vmem:[%s777_s2 + $0x40] sm:$0xff]  ;;  %v95_v26 = vld [vmem:[%s777_s2 + $0x50] sm:$0xff] }
  0x19   :  { %529 = vmatpush3.bf16.msra.mxu1 %v528_v15  ;;  %v94_v23 = vld [vmem:[%s777_s2 + $0x48] sm:$0xff]  ;;  %v534_v24 = vpack.c.bf16 %v182_v20, %v181_v19  ;;  %v96_v27 = vld [vmem:[%s777_s2 + $0x58] sm:$0xff]  ;;  %v97_v29 = vld [vmem:[%s777_s2 + $0x60] sm:$0xff] }
  0x1a   :  { %530 = vmatprep.subr.bf16.mxu1 %v613_v0  ;;  %v516_v25 = vpack.c.bf16 %v94_v23, %v93_v22  ;;  %v519_v28 = vpack.c.bf16 %v96_v27, %v95_v26  ;;  %v98_v30 = vld [vmem:[%s777_s2 + $0x68] sm:$0xff]  ;;  %v99_v32 = vld [vmem:[%s777_s2 + $0x70] sm:$0xff]  ;;  %v100_v33 = vld [vmem:[%s777_s2 + $0x78] sm:$0xff]  ;;  %s384_s2 = sadd.s32 4294967295, %s775_s0 }
  0x1b   :  { %508 = vmatpush3.bf16.msra.mxu0 %v507_v7  ;;  %v522_v31 = vpack.c.bf16 %v98_v30, %v97_v29  ;;  %v525_v34 = vpack.c.bf16 %v100_v33, %v99_v32  ;;  %v84_v35 = vld [vmem:[%s776_s1] sm:$0xff]  ;;  %v183_v36 = vld [vmem:[#allocation4 + $0x30] sm:$0xff]  ;;  %v184_v37 = vld [vmem:[#allocation4 + $0x38] sm:$0xff]  ;;  %p70_p8 = scmp.lt.s32.totalorder %s384_s2, 2 }
  0x1c   :  { %509 = vmatprep.subr.bf16.mxu0 %v613_v0  ;;  %v537_v38 = vpack.c.bf16 %v184_v37, %v183_v36  ;;  %v388_v39 = vld [vmem:[%s778_s3] ss:$0 sm:$0xff]  ;;  %v389_v56 = vld [vmem:[%s778_s3 + $0x1] ss:$0 sm:$0xff]  ;;  %s616_s3 = smov [#allocation7]  }
  0x1d   :  { %532 = vmatpush3.bf16.msra.mxu1 %v531_v18  ;;  %s784_s2 = smov (!%p70_p8, %s384_s2), 2  ;;  %s366_s11 = sshll.u32 %s616_s3, 4  ;;  %s367_s11 = int_to_ptr.vmem [resolvable:$true] %s366_s11 }
  0x1e   :  { %533 = vmatprep.subr.bf16.mxu1 %v613_v0  ;;  %s394_s26 = sshll.u32 %s784_s2, 6  ;;  %s81_s10 = scalar_lea.vmem %s781_s6, %s784_s2 }
  0x1f   :  { %511 = vmatpush3.bf16.msra.mxu0 %v510_v14  ;;  %s74_s1 = scalar_lea.vmem %s780_s5, %s394_s26  ;;  %v391_v61 = vld [vmem:[%s81_s10] ss:$0 sm:$0xff]  ;;  %s584_s12 = scalar_lea.vmem %s367_s11, 128 }
  0x20   :  { %512 = vmatprep.subr.bf16.mxu0 %v613_v0  ;;  %v265_v40 = vld [vmem:[%s74_s1] sm:$0xff]  ;;  %v266_v41 = vld [vmem:[%s74_s1 + $0x8] sm:$0xff]  ;;  %v267_v47 = vld [vmem:[%s74_s1 + $0x10] sm:$0xff]  ;;  %p585_p9 = scmp.ne.s32.totalorder %s367_s11, %s584_s12  ;;  %p589_p10 = scmp.lt.s32.totalorder %s367_s11, %s367_s11 }
  0x21   :  { %535 = vmatpush3.bf16.msra.mxu1 %v534_v24  ;;  %v540_v45 = vpack.c.bf16 %v266_v41, %v265_v40  ;;  %v268_v48 = vld [vmem:[%s74_s1 + $0x18] sm:$0xff]  ;;  %v269_v50 = vld [vmem:[%s74_s1 + $0x20] sm:$0xff]  ;;  %v270_v51 = vld [vmem:[%s74_s1 + $0x28] sm:$0xff]  ;;  %p590_p11 = scmp.lt.s32.totalorder %s584_s12, %s584_s12 }
  0x22   :  { %536 = vmatprep.subr.bf16.mxu1 %v613_v0  ;;  %v543_v49 = vpack.c.bf16 %v268_v48, %v267_v47  ;;  %v546_v52 = vpack.c.bf16 %v270_v51, %v269_v50  ;;  %v271_v53 = vld [vmem:[%s74_s1 + $0x30] sm:$0xff]  ;;  %v272_v54 = vld [vmem:[%s74_s1 + $0x38] sm:$0xff] }
  0x23   :  { %514 = vmatpush3.bf16.msra.mxu0 %v513_v21  ;;  %v549_v55 = vpack.c.bf16 %v272_v54, %v271_v53  ;;  %p591_p12 = por %p590_p11, %p589_p10 }
  0x24   :  { %515 = vmatprep.subr.bf16.mxu0 %v613_v0 }
  0x25   :  { %538 = vmatpush3.bf16.msra.mxu1 %v537_v38  ;;  %p592_p13 = pnand %p591_p12, %p585_p9 }
  0x26   :  { %539 = vmatprep.subr.bf16.mxu1 %v613_v0 }
  0x27   :  { %517 = vmatpush3.bf16.msra.mxu0 %v516_v25 }
  0x28   :  { %518 = vmatprep.subr.bf16.mxu0 %v613_v0 }
  0x2b   :  { %520 = vmatpush3.bf16.msra.mxu0 %v519_v28 }
  0x2c   :  { %521 = vmatprep.subr.bf16.mxu0 %v613_v0 }
  0x2f   :  { %523 = vmatpush3.bf16.msra.mxu0 %v522_v31 }
  0x30   :  { %524 = vmatprep.subr.bf16.mxu0 %v613_v0 }
  0x33   :  { %526 = vmatpush3.bf16.msra.mxu0 %v525_v34 }
  0x36   :  { %463 = vmatmul.mubr.f32.vlgmr.msra.gmra.mrb[0].mxu0 %v84_v35 }
 0x109   :  { %v172_v42 = vpop.f32.mrb[0].mxu0 }
 0x10a   :  { %v173_v43 = vadd.f32 %v388_v39, %v172_v42  ;;  %v464_v44 = vpop.f32.mrb[1].mxu0 }
 0x10c   :  { %v176_v46 = vmax.f32 %v173_v43, 0.0 }
 0x10e   :  { %482 = vmatmul.mubr.msk.f32.vlgmr.msra.gmra.mrb[0].mxu1 %vm190_vm1, %v176_v46 }
 0x10f   :  { %541 = vmatpush3.bf16.msra.mxu1 %v540_v45  ;;  %500 = vmatprep.mubr.msk.f32.mxu1 %vm614_vm0, %v615_v1 }
 0x110   :  { %542 = vmatprep.subr.bf16.mxu1 %v613_v0 }
 0x113   :  { %544 = vmatpush3.bf16.msra.mxu1 %v543_v49 }
 0x114   :  { %545 = vmatprep.subr.bf16.mxu1 %v613_v0 }
 0x117   :  { %547 = vmatpush3.bf16.msra.mxu1 %v546_v52 }
 0x118   :  { %548 = vmatprep.subr.bf16.mxu1 %v613_v0 }
 0x11b   :  { %550 = vmatpush3.bf16.msra.mxu1 %v549_v55 }
 0x1e1   :  { %v260_v57 = vpop.f32.mrb[0].mxu1 }
 0x1e2   :  { %v261_v58 = vadd.f32 %v389_v56, %v260_v57  ;;  %v483_v59 = vpop.f32.mrb[1].mxu1 }
 0x1e4   :  { %v264_v60 = vmax.f32 %v261_v58, 0.0 }
 0x1e6   :  { %501 = vmatmul.mubr.msk.f32.vlgmr.msra.gmra.mrb[2].mxu1 %vm190_vm1, %v264_v60 }
 0x2b9   :  { %v349_v62 = vpop.f32.mrb[2].mxu1 }
 0x2ba   :  { %v350_v63 = vadd.f32 %v391_v61, %v349_v62  ;;  %v502_v0 = vpop.f32.mrb[3].mxu1 }
 0x2bc   :  { %v393_v1 = vmul.f32 -1.442695, %v350_v63 }
 0x2be   :  { %558 = vpow2.f32 %v393_v1 }
 0x2c8   :  { %v559_v2 = vpop.eup %558 }
 0x2c9   :  { %v356_v3 = vadd.f32 1.0, %v559_v2 }
 0x2cb   :  { %560 = vrcp.f32 %v356_v3 }
 0x2d5   :  { %v561_v4 = vpop.eup %560 }
 0x2d6   :  { %359 = vst [vmem:[#allocation7] sm:$0xff] %v561_v4 }
 0x2d7   :  { %595 = shalt.err (!%p592_p13)
}
 0x2d8   :  { %s596_s14 = scalar_lea.hbm %s782_s7, 128 }
 0x2d9   :  { %p597_p0 = scmp.ne.s32.totalorder %s782_s7, %s596_s14  ;;  %p600_p1 = scmp.lt.u32.totalorder %s596_s14, %s782_s7 }
 0x2db   :  { %p602_p2 = pnand %p600_p1, %p597_p0 }
 0x2dd   :  { %605 = shalt.err (!%p602_p2)
}
 0x2de   :  { %369 = dma.vmem_to_hbm [thread:$0]  %s367_s11, 128, %s782_s7, [#allocation6]  }
 0x2df   :  { %608 = dma.done.wait [#allocation6], 128  }
 0x2e0   :  { %609 = vsyncadd [#allocation6], 4294967168 }
 0x2e1   :  { %373 = vsyncpa [#allocation5], 1 }
 0x2e2   :  { %374 = vsyncpa [#allocation6], 1 }

</bundles_post_ra>
